<compile_context>
chip_gen: v5e
topology: v5e:2x2
jax: 0.10.0
libtpu: 0.0.40
codegen_flags: <defaults>
</compile_context>

<pallas_src>
import numpy as np
import jax
import jax.numpy as jnp
from jax import lax
from jax.experimental import pallas as pl
from jax.experimental.pallas import tpu as pltpu


def _round_up(a, m):
    return (a + m - 1) // m * m


def wide_and_deep_kernel(emb_ref, wide_ref, w1_ref, b1_ref, w2t_ref, bias_ref,
                         out_ref):
    # Deep layer 1 on the MXU: bf16 x bf16 -> f32 accumulate; bias/ReLU in f32
    # on the VPU.
    h = jnp.dot(emb_ref[...], w1_ref[...],
                preferred_element_type=jnp.float32)              # (TB, Hp) f32
    h = jnp.maximum(h + b1_ref[...], 0.0)
    # TODO(synk): dropout omitted (inference / eval-mode semantics).

    # Deep layer 2 as a (1,Hp) x (TB,Hp)^T contraction on the MXU: result is
    # already lane-dense (1, TB), so no (TB,1) column / masked stores anywhere.
    deep = lax.dot_general(
        w2t_ref[...], h,
        dimension_numbers=(((1,), (1,)), ((), ())),
        preferred_element_type=jnp.float32)                      # (1, TB) f32

    logit = deep + wide_ref[0] + bias_ref[0, 0]                  # (1, TB)
    # sigmoid: exp on the EUP, divide via approx reciprocal (also EUP).
    out_ref[0] = pl.reciprocal(1.0 + jnp.exp(-logit), approx=True)


def wide_and_deep_forward(x, params, *, block_b=1024):
    """x: int32 (B, F) field indices. Returns f32 (B,) label probabilities."""
    offsets = params["offsets"]                  # (F,)
    idx = x + offsets[None, :]                   # (B, F) global row indices

    # Embedding gather stays in plain JAX; the table is stored in bf16 so the
    # random-access gather (the dominant HBM cost at production batch sizes)
    # moves half the bytes and needs no post-gather cast pass.
    # TODO(synk): only fuse the gather into the kernel if rows reach ~512 B
    # (per-field contiguous slabs); at E=16 (32 B/row) a per-row manual DMA
    # gather is descriptor-bound and loses to XLA's gather.
    emb = jnp.take(params["embed_table"], idx, axis=0)           # (B, F, E) bf16
    B, F, E = emb.shape
    K = F * E
    emb = emb.reshape(B, K)                                      # (B, K) bf16

    # Wide part precomputed here (XLA fuses the tiny reduce into the gather);
    # it is fed to the kernel lane-dense, removing the badly-shaped (TB, F=4)
    # DMA stream entirely.
    lin = jnp.take(params["linear_table"], idx, axis=0)[..., 0].astype(jnp.float32)
    wide = jnp.sum(lin, axis=1)                                  # (B,) f32

    # Pad hidden dim to a full 128-lane tile (zero-padded w2t columns mean the
    # padded hidden units contribute nothing).
    H = params["w1"].shape[1]
    Hp = _round_up(max(H, 128), 128)
    w1p = jnp.pad(params["w1"].astype(jnp.bfloat16), ((0, 0), (0, Hp - H)))
    b1p = jnp.pad(params["b1"].astype(jnp.float32), ((0, 0), (0, Hp - H)))
    w2tp = jnp.pad(params["w2t"].astype(jnp.float32), ((0, 0), (0, Hp - H)))
    bias = (params["wide_bias"] + params["b2"]).astype(jnp.float32)  # (1,1)

    # Batch tiling: large lane-aligned tiles (per-grid-step fixed cost ~0.35us
    # dominates small tiles), but keep >= 2 grid steps whenever the batch has
    # >= 2 lane-tiles so v7x megacore has something to shard.
    b128 = _round_up(B, 128)
    TB = max(128, (min(block_b, b128) // 128) * 128)
    if b128 >= 2 * 128:
        TB = min(TB, max(128, (b128 // 2) // 128 * 128))
    B_pad = _round_up(B, TB)
    num_tiles = B_pad // TB

    if B_pad != B:
        emb = jnp.pad(emb, ((0, B_pad - B), (0, 0)))
        wide = jnp.pad(wide, ((0, B_pad - B),))
    wide = wide.reshape(num_tiles, 1, TB)

    # Explicit VMEM budget (v7x: 64 MiB physical / 32 MiB default scoped).
    vmem_bytes = (2 * TB * K * 2        # emb double buffer (bf16)
                  + 2 * TB * 4          # wide double buffer (lane-dense f32)
                  + 2 * K * Hp * 2      # w1 (VMEM-resident, double-buffered)
                  + 4 * Hp * 4          # b1 + w2t
                  + 2 * TB * 4          # lane-dense output double buffer
                  + TB * Hp * 4)        # f32 hidden intermediate
    vmem_limit = int(min(max(2 * vmem_bytes, 8 << 20), 32 << 20))

    cost = pl.CostEstimate(
        flops=2 * B_pad * K * Hp + 2 * B_pad * Hp,
        transcendentals=2 * B_pad,
        bytes_accessed=(B_pad * K * 2 + B_pad * 4 + K * Hp * 2
                        + 2 * Hp * 4 + 4 + B_pad * 4),
    )

    out = pl.pallas_call(
        wide_and_deep_kernel,
        out_shape=jax.ShapeDtypeStruct((num_tiles, 1, TB), jnp.float32),
        grid_spec=pltpu.PrefetchScalarGridSpec(
            num_scalar_prefetch=0,
            grid=(num_tiles,),
            in_specs=[
                # streamed per batch tile (double-buffered by Pallas)
                pl.BlockSpec((TB, K), lambda i: (i, 0)),
                pl.BlockSpec((1, 1, TB), lambda i: (i, 0, 0)),
                # weights: constant block index -> VMEM-resident across steps
                pl.BlockSpec((K, Hp), lambda i: (0, 0)),
                pl.BlockSpec((1, Hp), lambda i: (0, 0)),
                pl.BlockSpec((1, Hp), lambda i: (0, 0)),
                # combined scalar bias lives in SMEM
                pl.BlockSpec(memory_space=pltpu.MemorySpace.SMEM),
            ],
            out_specs=pl.BlockSpec((1, 1, TB), lambda i: (i, 0, 0)),
        ),
        compiler_params=pltpu.CompilerParams(
            dimension_semantics=("parallel",),
            vmem_limit_bytes=vmem_limit,
        ),
        cost_estimate=cost,
    )(emb, wide, w1p, b1p, w2tp, bias)

    return out.reshape(B_pad)[:B]          # squeeze(1), drop batch padding


def wide_and_deep_reference(x, params):
    """Pure-JAX reference (f32 math) for correctness checking."""
    idx = x + params["offsets"][None, :]
    emb = jnp.take(params["embed_table"], idx, axis=0).astype(jnp.float32)
    B, F, E = emb.shape
    emb = emb.reshape(B, F * E)
    lin = jnp.take(params["linear_table"], idx, axis=0)[..., 0].astype(jnp.float32)
    wide = jnp.sum(lin, axis=1, keepdims=True) + params["wide_bias"]
    h = jnp.maximum(emb @ params["w1"] + params["b1"], 0.0)
    deep = jnp.sum(h * params["w2t"], axis=1, keepdims=True) + params["b2"]
    return jax.nn.sigmoid((wide + deep)[:, 0])


def init_params(key, field_dims, embed_dim, mlp_dims):
    num_fields = len(field_dims)
    total_rows = int(np.sum(field_dims))
    embed_out = num_fields * embed_dim
    hidden = mlp_dims

    k = jax.random.split(key, 6)
    offsets = jnp.asarray(np.concatenate(([0], np.cumsum(field_dims)[:-1])),
                          dtype=jnp.int32)
    params = {
        "offsets": offsets,
        # Embedding table stored in bf16: halves the dominant gather traffic.
        # (Expected ~1e-2-level deviation vs an all-f32 model -- intentional.)
        "embed_table": (0.02 * jax.random.normal(
            k[0], (total_rows, embed_dim), jnp.float32)).astype(jnp.bfloat16),
        "linear_table": 0.02 * jax.random.normal(k[1], (total_rows, 1),
                                                 jnp.float32),
        "wide_bias": jnp.zeros((1, 1), jnp.float32),
        # Deep MLP: Linear(embed_out, hidden) -> relu -> Linear(hidden, 1)
        "w1": (1.0 / np.sqrt(embed_out)) *
              jax.random.normal(k[2], (embed_out, hidden), jnp.float32),
        "b1": 0.01 * jax.random.normal(k[3], (1, hidden), jnp.float32),
        "w2t": (1.0 / np.sqrt(hidden)) *
               jax.random.normal(k[4], (1, hidden), jnp.float32),
        "b2": 0.01 * jax.random.normal(k[5], (1, 1), jnp.float32),
    }
    return params


if __name__ == "__main__":
    field_dims = [10, 20, 30, 40]   # 4 categorical fields
    embed_dim = 16                  # F*E = 64
    mlp_dims = 32                   # hidden (padded to 128 inside the wrapper)
    batch = 1024                    # TB=512 -> 2 grid steps (megacore-friendly)

    key = jax.random.PRNGKey(0)
    pkey, xkey = jax.random.split(key)
    params = init_params(pkey, field_dims, embed_dim, mlp_dims)

    # x: int (batch, num_fields), each column in [0, field_dims[f])
    cols = []
    xkeys = jax.random.split(xkey, len(field_dims))
    for f, fd in enumerate(field_dims):
        cols.append(jax.random.randint(xkeys[f], (batch,), 0, fd, jnp.int32))
    x = jnp.stack(cols, axis=1)

    probs = jax.jit(wide_and_deep_forward)(x, params)
    jax.block_until_ready(probs)

    assert probs.shape == (batch,)
    assert bool(jnp.all(jnp.isfinite(probs)))

    ref = wide_and_deep_reference(x, params)
    max_err = float(jnp.max(jnp.abs(probs - ref)))
    # bf16 embeddings/w1 + approx reciprocal => small deviation vs f32 reference.
    assert max_err < 5e-2, f"mismatch vs reference: {max_err}"

    print("KERNEL_OK")
</pallas_src>

<mosaic_0001>
module attributes {stable_mosaic.version = 11 : i64} {
  func.func @wide_and_deep_kernel(%arg0: i32, %arg1: memref<512x64xbf16, #tpu.memory_space<vmem>>, %arg2: memref<1x1x512xf32, #tpu.memory_space<vmem>>, %arg3: memref<64x128xbf16, #tpu.memory_space<vmem>>, %arg4: memref<1x128xf32, #tpu.memory_space<vmem>>, %arg5: memref<1x128xf32, #tpu.memory_space<vmem>>, %arg6: memref<1x1xf32, #tpu.memory_space<smem>>, %arg7: memref<1x1x512xf32, #tpu.memory_space<vmem>>) attributes {dimension_semantics = [#tpu.dimension_semantics<parallel>], iteration_bounds = array<i64: 2>, scalar_prefetch = 0 : i64, scratch_operands = 0 : i64, tpu.core_type = #tpu.core_type<tc>, window_params = [{transform_indices = @transform_0, window_bounds = array<i64: 512, 64>}, {transform_indices = @transform_1, window_bounds = array<i64: 1, 1, 512>}, {pipeline_mode = #tpu.pipeline_mode<synchronous>, transform_indices = @transform_2, window_bounds = array<i64: 64, 128>}, {pipeline_mode = #tpu.pipeline_mode<synchronous>, transform_indices = @transform_3, window_bounds = array<i64: 1, 128>}, {pipeline_mode = #tpu.pipeline_mode<synchronous>, transform_indices = @transform_4, window_bounds = array<i64: 1, 128>}, {transform_indices = @transform_5, window_bounds = array<i64: 1, 1>}, {transform_indices = @transform_6, window_bounds = array<i64: 1, 1, 512>}]} {
    %c0 = arith.constant 0 : index
    %c0_0 = arith.constant 0 : index
    %0 = vector.load %arg1[%c0, %c0_0] : memref<512x64xbf16, #tpu.memory_space<vmem>>, vector<512x64xbf16>
    %c0_1 = arith.constant 0 : index
    %c0_2 = arith.constant 0 : index
    %1 = vector.load %arg3[%c0_1, %c0_2] : memref<64x128xbf16, #tpu.memory_space<vmem>>, vector<64x128xbf16>
    %cst = arith.constant dense<0.000000e+00> : vector<512x128xf32>
    %2 = tpu.matmul %0, %1, %cst {dimension_numbers = #tpu.dot_dimension_numbers<[1], [0], [0], [1], [0, 0, 1, 1], [], []>} : vector<512x64xbf16>, vector<64x128xbf16>, vector<512x128xf32> -> vector<512x128xf32>
    %c0_3 = arith.constant 0 : index
    %c0_4 = arith.constant 0 : index
    %3 = vector.load %arg4[%c0_3, %c0_4] : memref<1x128xf32, #tpu.memory_space<vmem>>, vector<1x128xf32>
    %4 = vector.broadcast %3 : vector<1x128xf32> to vector<512x128xf32>
    %5 = arith.addf %2, %4 : vector<512x128xf32>
    %cst_5 = arith.constant 0.000000e+00 : f32
    %6 = vector.broadcast %cst_5 : f32 to vector<512x128xf32>
    %7 = arith.maximumf %5, %6 : vector<512x128xf32>
    %c0_6 = arith.constant 0 : index
    %c0_7 = arith.constant 0 : index
    %8 = vector.load %arg5[%c0_6, %c0_7] : memref<1x128xf32, #tpu.memory_space<vmem>>, vector<1x128xf32>
    %cst_8 = arith.constant dense<0.000000e+00> : vector<1x512xf32>
    %9 = tpu.matmul %8, %7, %cst_8 {dimension_numbers = #tpu.dot_dimension_numbers<[1], [1], [0], [0], [0, 0, 1, 0], [], []>} : vector<1x128xf32>, vector<512x128xf32>, vector<1x512xf32> -> vector<1x512xf32>
    %c0_9 = arith.constant 0 : index
    %c0_10 = arith.constant 0 : index
    %c0_11 = arith.constant 0 : index
    %10 = vector.load %arg2[%c0_9, %c0_10, %c0_11] : memref<1x1x512xf32, #tpu.memory_space<vmem>>, vector<1x1x512xf32>
    %11 = vector.shape_cast %10 : vector<1x1x512xf32> to vector<1x512xf32>
    %12 = arith.addf %9, %11 : vector<1x512xf32>
    %c0_12 = arith.constant 0 : index
    %c0_13 = arith.constant 0 : index
    %13 = memref.load %arg6[%c0_12, %c0_13] : memref<1x1xf32, #tpu.memory_space<smem>>
    %14 = vector.broadcast %13 : f32 to vector<1x512xf32>
    %15 = arith.addf %12, %14 : vector<1x512xf32>
    %cst_14 = arith.constant 0.000000e+00 : f32
    %16 = vector.broadcast %cst_14 : f32 to vector<1x512xf32>
    %17 = arith.subf %16, %15 : vector<1x512xf32>
    %18 = math.exp %17 : vector<1x512xf32>
    %cst_15 = arith.constant 1.000000e+00 : f32
    %19 = vector.broadcast %cst_15 : f32 to vector<1x512xf32>
    %20 = arith.addf %19, %18 : vector<1x512xf32>
    %21 = tpu.reciprocal %20 {approx = true} : vector<1x512xf32> -> vector<1x512xf32>
    %c0_16 = arith.constant 0 : index
    %c0_17 = arith.constant 0 : index
    %c0_18 = arith.constant 0 : index
    %22 = vector.load %arg7[%c0_16, %c0_17, %c0_18] : memref<1x1x512xf32, #tpu.memory_space<vmem>>, vector<1x1x512xf32>
    %23 = vector.shape_cast %22 : vector<1x1x512xf32> to vector<1x512xf32>
    %24 = vector.shape_cast %21 : vector<1x512xf32> to vector<1x1x512xf32>
    tpu.vector_store %arg7[%c0_16, %c0_17, %c0_18], %24 {strides = array<i32>} : memref<1x1x512xf32, #tpu.memory_space<vmem>>, vector<1x1x512xf32>,
    return
  }
  func.func @transform_0(%arg0: i32) -> (i32, i32) {
    %c0_i32 = arith.constant 0 : i32
    %c0_i32_0 = arith.constant 0 : i32
    return %arg0, %c0_i32 : i32, i32
  }
  func.func @transform_1(%arg0: i32) -> (i32, i32, i32) {
    %c0_i32 = arith.constant 0 : i32
    %c0_i32_0 = arith.constant 0 : i32
    %c0_i32_1 = arith.constant 0 : i32
    return %arg0, %c0_i32, %c0_i32_0 : i32, i32, i32
  }
  func.func @transform_2(%arg0: i32) -> (i32, i32) {
    %c0_i32 = arith.constant 0 : i32
    %c0_i32_0 = arith.constant 0 : i32
    %c0_i32_1 = arith.constant 0 : i32
    return %c0_i32, %c0_i32_0 : i32, i32
  }
  func.func @transform_3(%arg0: i32) -> (i32, i32) {
    %c0_i32 = arith.constant 0 : i32
    %c0_i32_0 = arith.constant 0 : i32
    %c0_i32_1 = arith.constant 0 : i32
    return %c0_i32, %c0_i32_0 : i32, i32
  }
  func.func @transform_4(%arg0: i32) -> (i32, i32) {
    %c0_i32 = arith.constant 0 : i32
    %c0_i32_0 = arith.constant 0 : i32
    %c0_i32_1 = arith.constant 0 : i32
    return %c0_i32, %c0_i32_0 : i32, i32
  }
  func.func @transform_5(%arg0: i32) -> (i32, i32) {
    %c0_i32 = arith.constant 0 : i32
    %c0_i32_0 = arith.constant 0 : i32
    %c0_i32_1 = arith.constant 0 : i32
    return %c0_i32, %c0_i32_0 : i32, i32
  }
  func.func @transform_6(%arg0: i32) -> (i32, i32, i32) {
    %c0_i32 = arith.constant 0 : i32
    %c0_i32_0 = arith.constant 0 : i32
    %c0_i32_1 = arith.constant 0 : i32
    return %arg0, %c0_i32, %c0_i32_0 : i32, i32, i32
  }
}

</mosaic_0001>

<bundles_post_ra>
// kernel: wide_and_deep_forward.1
= control target key start
LH: loop header
LB: loop body
LE: loop exit
PB: predicated region body
PF: predicated region fallthrough
CT: control target
= control target key end

     0   :  { %s1821_s0 = inlined_call_operand.vmem [shape: bf16[1024,64], index: 0, kind: input, shape index: {}]   ;;  %s1822_s1 = inlined_call_operand.vmem [shape: f32[2,1,512], index: 1, kind: input, shape index: {}]   ;;  %s1823_s2 = inlined_call_operand.vmem [shape: bf16[64,128], index: 2, kind: input, shape index: {}]   ;;  %s1824_s3 = inlined_call_operand.vmem [shape: f32[1,128], index: 3, kind: input, shape index: {}]   ;;  %s1825_s4 = inlined_call_operand.vmem [shape: f32[1,128], index: 4, kind: input, shape index: {}]   ;;  %s1826_s5 = inlined_call_operand.<no memory space> [shape: f32[1,1], index: 5, kind: input, shape index: {}]   ;;  %s1827_s6 = inlined_call_operand.hbm [shape: f32[2,1,512], index: 6, kind: output, shape index: {}]  }
   0x1   :  { %11 = sst [smem:[#allocation2]] %s1826_s5 }
   0x2   :  { %12 = vsyncpa [#allocation4], 0 }
   0x3   :  { %14 = vsyncpa [#allocation4 + $0x1], 0  ;;  %s1474_s23 = smov 0   ;;  %s1476_s24 = smov 0  }
   0x4   :  { %s1478_s25 = smov 0   ;;  %s1480_s26 = smov 0  }
   0x5 LB: > { %s1495_s5 = sadd.s32 4294967295, %s1434_s26   ;;  %s1084_s27 = sadd.s32 4294967294, %s1434_s26   ;;  %s1434_s26 = sphi %s1480_s26, %s1833_s26   ;;  %s1430_s25 = sphi %s1478_s25, %s1832_s25   ;;  %s1426_s24 = sphi %s1476_s24, %s1831_s24   ;;  %s1422_s23 = sphi %s1474_s23, %s1830_s23  }
   0x6   : > { %s1499_s28 = sadd.s32 1, %s1434_s26   ;;  %s163_s29 = sadd.s32 1, %s1430_s25 }
   0x7   : > { %s160_s30 = ssub.s32 %s1434_s26, %s1499_s28  ;;  %p173_p0 = scmp.ne.s32.totalorder %s1430_s25, %s1426_s24 }
   0x8   : > { %p161_p1 = scmp.eq.s32.totalorder %s160_s30, 0  ;;  %p174_p2 = scmp.eq.s32.totalorder %s1495_s5, 1 }
   0x9   : > { %p179_p3 = scmp.ne.s32.totalorder %s1426_s24, %s1422_s23  ;;  %p180_p4 = scmp.eq.s32.totalorder %s1084_s27, 1 }
   0xa   : > { %s1510_s7 = scalar_select %p161_p1, %s1430_s25, %s163_s29  }
   0xb   : > { %p1512_p5 = por %p174_p2, %p173_p0  ;;  %p1516_p6 = por %p180_p4, %p179_p3 }
   0xc   : > { %p1087_p7 = scmp.ge.s32.totalorder %s1434_s26, 1  ;;  %p226_p8 = scmp.lt.s32.totalorder %s1434_s26, 3 }
   0xe   : > { %p227_p9 = pnand %p1087_p7, %p226_p8 }
   0xf   : > { %s1089_s12 = sshll.u32 (!%p227_p9), %s1495_s5, 6  ;;  %p266_p11 = scmp.lt.s32.totalorder (!%p227_p9), %s1495_s5, 1 }
  0x10   : > { %230 = sbr.rel (%p227_p9) target bundleno = 571 (0x23b), region = 44  ;;  %p261_p10 = scmp.lt.s32.totalorder (!%p227_p9), %s1089_s12, 127 }
  0x11   : > { %s952_s16 = sld [smem:[#allocation2]] (!%p227_p9)  ;;  %s1269_s19 = sshll.u32 (!%p227_p9), %s1495_s5, 2 }
  0x12   : > { %s1392_s14 = scalar_lea.hbm (!%p227_p9), %s1827_s6, 8 }
  0x15   : > { %v1307_v0 = vld [vmem:[%s1823_s2 + $0x18] sm:$0xff]  ;;  %v1306_v1 = vld [vmem:[%s1823_s2 + $0x10] sm:$0xff]  ;;  %s1835_s12 = smov (!%p261_p10, %s1089_s12), 127  ;;  %v1305_v2 = vld [vmem:[%s1823_s2 + $0x8] sm:$0xff]  ;;  %vm531_vm0 = vcmask 523264   ;;  %vm985_vm1 = vcmask 1040384  }
  0x16   : > { %632 = vmatpush.bf16.msra.mxu0 %v1307_v0  ;;  %1308 = vmatpush.bf16.msra.mxu2 %v1307_v0  ;;  %s1090_s17 = sshll.u32 %s1835_s12, 2  ;;  %v1304_v3 = vld [vmem:[%s1823_s2] sm:$0xff]  ;;  %vm987_vm2 = vcmask 1042434   ;;  %vm989_vm3 = vcmask 1041408  }
  0x17   : > { %1309 = vmatpush.bf16.msra.mxu3 %v1307_v0  ;;  %s1538_s22 = scalar_lea.vmem %s1821_s0, %s1090_s17  ;;  %v1627_v52 = vld [vmem:[%s1824_s3] ss:$0 sm:$0xff]  ;;  %s257_s17 = sand.u32 1, %s1426_s24  }
  0x18   : > { %v1272_v4 = vld [vmem:[%s1538_s22] sm:$0xff]  ;;  %v1283_v5 = vld [vmem:[%s1538_s22 + $0x58] sm:$0xff]  ;;  %v1293_v6 = vld [vmem:[%s1538_s22 + $0xa8] sm:$0xff]  ;;  %s267_s11 = scalar_select %p266_p11, %s1495_s5, 1 }
  0x19   : > { %v1273_v7 = vld [vmem:[%s1538_s22 + $0x8] sm:$0xff]  ;;  %v1284_v8 = vld [vmem:[%s1538_s22 + $0x60] sm:$0xff]  ;;  %v1294_v9 = vld [vmem:[%s1538_s22 + $0xb0] sm:$0xff]  ;;  %s1088_s18 = sshll.u32 %s257_s17, 2  ;;  %s998_s5 = scalar_lea.sflag [#allocation4], %s257_s17 }
  0x1a   : > { %633 = vmatpush.bf16.msra.mxu0 %v1306_v1  ;;  %1310 = vmatpush.bf16.msra.mxu2 %v1306_v1  ;;  %v1274_v10 = vld [vmem:[%s1538_s22 + $0x10] sm:$0xff]  ;;  %v1285_v11 = vld [vmem:[%s1538_s22 + $0x68] sm:$0xff]  ;;  %v1295_v12 = vld [vmem:[%s1538_s22 + $0xb8] sm:$0xff]  ;;  %s1091_s12 = sshll.u32 %s267_s11, 2  ;;  %s259_s27 = scalar_lea.vmem [#allocation3], %s1088_s18 }
  0x1b   : > { %1311 = vmatpush.bf16.msra.mxu3 %v1306_v1  ;;  %v1275_v13 = vld [vmem:[%s1538_s22 + $0x18] sm:$0xff]  ;;  %v1286_v14 = vld [vmem:[%s1538_s22 + $0x70] sm:$0xff]  ;;  %v1296_v15 = vld [vmem:[%s1538_s22 + $0xc0] sm:$0xff]  ;;  %s269_s15 = scalar_lea.vmem %s1822_s1, %s1091_s12  ;;  %s1010_s29 = sshll.u32 %s259_s27, 4  ;;  %s1011_s29 = int_to_ptr.vmem [resolvable:$true] %s1010_s29 }
  0x1c   : > { %v1276_v16 = vld [vmem:[%s1538_s22 + $0x20] sm:$0xff]  ;;  %v1287_v17 = vld [vmem:[%s1538_s22 + $0x78] sm:$0xff]  ;;  %v1297_v18 = vld [vmem:[%s1538_s22 + $0xc8] sm:$0xff] }
  0x1d   : > { %v1277_v19 = vld [vmem:[%s1538_s22 + $0x28] sm:$0xff]  ;;  %v1288_v20 = vld [vmem:[%s1538_s22 + $0x80] sm:$0xff]  ;;  %v1298_v21 = vld [vmem:[%s1538_s22 + $0xd0] sm:$0xff] }
  0x1e   : > { %634 = vmatpush.bf16.msra.mxu0 %v1305_v2  ;;  %1312 = vmatpush.bf16.msra.mxu2 %v1305_v2  ;;  %v1278_v22 = vld [vmem:[%s1538_s22 + $0x30] sm:$0xff]  ;;  %v1289_v23 = vld [vmem:[%s1538_s22 + $0x88] sm:$0xff]  ;;  %v1299_v24 = vld [vmem:[%s1538_s22 + $0xd8] sm:$0xff] }
  0x1f   : > { %1313 = vmatpush.bf16.msra.mxu3 %v1305_v2  ;;  %v1279_v25 = vld [vmem:[%s1538_s22 + $0x38] sm:$0xff]  ;;  %v1290_v26 = vld [vmem:[%s1538_s22 + $0x90] sm:$0xff]  ;;  %v1300_v27 = vld [vmem:[%s1538_s22 + $0xe0] sm:$0xff] }
  0x20   : > { %v1280_v28 = vld [vmem:[%s1538_s22 + $0x40] sm:$0xff]  ;;  %v1291_v29 = vld [vmem:[%s1538_s22 + $0x98] sm:$0xff]  ;;  %v1301_v31 = vld [vmem:[%s1538_s22 + $0xe8] sm:$0xff] }
  0x21   : > { %v1281_v37 = vld [vmem:[%s1538_s22 + $0x48] sm:$0xff]  ;;  %v1292_v38 = vld [vmem:[%s1538_s22 + $0xa0] sm:$0xff]  ;;  %v1302_v40 = vld [vmem:[%s1538_s22 + $0xf0] sm:$0xff] }
  0x22   : > { %635 = vmatpush.bf16.msra.mxu0 %v1304_v3  ;;  %1314 = vmatpush.bf16.msra.mxu2 %v1304_v3  ;;  %v1282_v46 = vld [vmem:[%s1538_s22 + $0x50] sm:$0xff]  ;;  %v1303_v48 = vld [vmem:[%s1538_s22 + $0xf8] sm:$0xff]  ;;  %s1008_s22 = scalar_lea.hbm %s1827_s6, %s1269_s19 }
  0x23   : > { %1315 = vmatpush.bf16.msra.mxu3 %v1304_v3  ;;  %s1012_s30 = sshll.u32 %s1008_s22, 4  ;;  %s1013_s30 = int_to_ptr.hbm [resolvable:$true] %s1012_s30 }
  0x24   : > { %s1386_s10 = sshra.s32 %s1013_s30, 4  ;;  %s1387_s10 = int_to_ptr.hbm [resolvable:$true] %s1386_s10 }
  0x25   : > { %1236 = vmatmul.msk.bf16.vlgmr.msra.gmra.mxu0 %vm531_vm0, %v1272_v4  ;;  %1247 = vmatmul.msk.bf16.vlgmr.msra.gmra.mxu2 %vm531_vm0, %v1283_v5  ;;  %s1388_s11 = scalar_lea.hbm %s1387_s10, 4  ;;  %p1393_p1 = scmp.lt.s32.totalorder %s1387_s10, %s1827_s6 }
  0x26   : > { %1257 = vmatmul.msk.bf16.vlgmr.msra.gmra.mxu3 %vm531_vm0, %v1293_v6  ;;  %p1389_p12 = scmp.ne.s32.totalorder %s1387_s10, %s1388_s11  ;;  %p1394_p2 = scmp.lt.s32.totalorder %s1392_s14, %s1388_s11 }
  0x28   : > { %p1390_p13 = pnand %p1389_p12, %p1512_p5  ;;  %p1395_p3 = por %p1394_p2, %p1393_p1 }
  0x2a   : > { %p1391_p0 = pneg %p1390_p13 }
  0x2c   : > { %p1396_p4 = pnand %p1395_p3, %p1391_p0 }
  0x35   : > { %1237 = vmatmul.msk.bf16.gmra.mxu0 %vm531_vm0, %v1273_v7  ;;  %1248 = vmatmul.msk.bf16.gmra.mxu2 %vm531_vm0, %v1284_v8 }
  0x36   : > { %1258 = vmatmul.msk.bf16.gmra.mxu3 %vm531_vm0, %v1294_v9 }
  0x45   : > { %1238 = vmatmul.msk.bf16.gmra.mxu0 %vm531_vm0, %v1274_v10  ;;  %1249 = vmatmul.msk.bf16.gmra.mxu2 %vm531_vm0, %v1285_v11 }
  0x46   : > { %1259 = vmatmul.msk.bf16.gmra.mxu3 %vm531_vm0, %v1295_v12 }
  0x55   : > { %1239 = vmatmul.msk.bf16.gmra.mxu0 %vm531_vm0, %v1275_v13  ;;  %1250 = vmatmul.msk.bf16.gmra.mxu2 %vm531_vm0, %v1286_v14 }
  0x56   : > { %1260 = vmatmul.msk.bf16.gmra.mxu3 %vm531_vm0, %v1296_v15 }
  0x65   : > { %1240 = vmatmul.msk.bf16.gmra.mxu0 %vm531_vm0, %v1276_v16  ;;  %1251 = vmatmul.msk.bf16.gmra.mxu2 %vm531_vm0, %v1287_v17 }
  0x66   : > { %1261 = vmatmul.msk.bf16.gmra.mxu3 %vm531_vm0, %v1297_v18 }
  0x75   : > { %1241 = vmatmul.msk.bf16.gmra.mxu0 %vm531_vm0, %v1277_v19  ;;  %1252 = vmatmul.msk.bf16.gmra.mxu2 %vm531_vm0, %v1288_v20 }
  0x76   : > { %1262 = vmatmul.msk.bf16.gmra.mxu3 %vm531_vm0, %v1298_v21 }
  0x85   : > { %1242 = vmatmul.msk.bf16.gmra.mxu0 %vm531_vm0, %v1278_v22  ;;  %1253 = vmatmul.msk.bf16.gmra.mxu2 %vm531_vm0, %v1289_v23 }
  0x86   : > { %1263 = vmatmul.msk.bf16.gmra.mxu3 %vm531_vm0, %v1299_v24 }
  0x95   : > { %1243 = vmatmul.msk.bf16.gmra.mxu0 %vm531_vm0, %v1279_v25  ;;  %1254 = vmatmul.msk.bf16.gmra.mxu2 %vm531_vm0, %v1290_v26 }
  0x96   : > { %1264 = vmatmul.msk.bf16.gmra.mxu3 %vm531_vm0, %v1300_v27 }
  0xa2   : > { %v1590_v30 = vpop.f32.mrf.mxu0 }
  0xa5   : > { %1244 = vmatmul.msk.bf16.gmra.mxu0 %vm531_vm0, %v1280_v28  ;;  %1255 = vmatmul.msk.bf16.gmra.mxu2 %vm531_vm0, %v1291_v29 }
  0xa6   : > { %1265 = vmatmul.msk.bf16.gmra.mxu3 %vm531_vm0, %v1301_v31 }
  0xa8   : > { %v1596_v32 = vpop.f32.mrf.mxu2 }
  0xa9   : > { %v742_v33 = vpop.f32.mrf.mxu3 }
  0xaa   : > { %v1598_v34 = vpop.f32.mrf.mxu0  ;;  %v743_v7 = vadd.f32 %v1627_v52, %v742_v33 }
  0xac   : > { %v839_v9 = vmax.f32 %v743_v7, 0.0 }
  0xb0   : > { %v1600_v35 = vpop.f32.mrf.mxu2 }
  0xb1   : > { %v744_v36 = vpop.f32.mrf.mxu3 }
  0xb2   : > { %v1604_v39 = vpop.f32.mrf.mxu0  ;;  %v745_v2 = vadd.f32 %v1627_v52, %v744_v36 }
  0xb4   : > { %v840_v8 = vmax.f32 %v745_v2, 0.0 }
  0xb5   : > { %1245 = vmatmul.msk.bf16.gmra.mxu0 %vm531_vm0, %v1281_v37  ;;  %1256 = vmatmul.msk.bf16.gmra.mxu2 %vm531_vm0, %v1292_v38 }
  0xb6   : > { %1266 = vmatmul.msk.bf16.gmra.mxu3 %vm531_vm0, %v1302_v40 }
  0xb8   : > { %v1610_v41 = vpop.f32.mrf.mxu2 }
  0xb9   : > { %v747_v42 = vpop.f32.mrf.mxu3 }
  0xba   : > { %v1612_v43 = vpop.f32.mrf.mxu0  ;;  %v748_v0 = vadd.f32 %v1627_v52, %v747_v42 }
  0xbc   : > { %v841_v3 = vmax.f32 %v748_v0, 0.0 }
  0xc0   : > { %v1614_v44 = vpop.f32.mrf.mxu2 }
  0xc1   : > { %v749_v45 = vpop.f32.mrf.mxu3  ;;  %v700_v37 = vadd.f32 %v1627_v52, %v1614_v44 }
  0xc2   : > { %v1617_v47 = vpop.f32.mrf.mxu0  ;;  %v750_v59 = vadd.f32 %v1627_v52, %v749_v45 }
  0xc4   : > { %v842_v1 = vmax.f32 %v750_v59, 0.0 }
  0xc5   : > { %1246 = vmatmul.msk.bf16.gmra.mxu0 %vm531_vm0, %v1282_v46  ;;  %v698_v46 = vadd.f32 %v1627_v52, %v1610_v41 }
  0xc6   : > { %1267 = vmatmul.msk.bf16.gmra.mxu3 %vm531_vm0, %v1303_v48  ;;  %v822_v48 = vmax.f32 %v700_v37, 0.0 }
  0xc8   : > { %v702_v49 = vpop.f32.mrf.mxu2 }
  0xc9   : > { %v752_v50 = vpop.f32.mrf.mxu3  ;;  %v703_v33 = vadd.f32 %v1627_v52, %v702_v49  ;;  %v695_v49 = vadd.f32 %v1627_v52, %v1600_v35 }
  0xca   : > { %v1622_v51 = vpop.f32.mrf.mxu0  ;;  %v753_v57 = vadd.f32 %v1627_v52, %v752_v50  ;;  %v821_v50 = vmax.f32 %v698_v46, 0.0 }
  0xcb   : > { %v823_v38 = vmax.f32 %v703_v33, 0.0 }
  0xcc   : > { %v843_v60 = vmax.f32 %v753_v57, 0.0  ;;  %v820_v57 = vmax.f32 %v695_v49, 0.0 }
  0xd0   : > { %v704_v53 = vpop.f32.mrf.mxu2 }
  0xd1   : > { %v754_v54 = vpop.f32.mrf.mxu3  ;;  %v705_v27 = vadd.f32 %v1627_v52, %v704_v53 }
  0xd2   : > { %v755_v55 = vadd.f32 %v1627_v52, %v754_v54  ;;  %v1630_v56 = vpop.f32.mrf.mxu0 }
  0xd3   : > { %v824_v36 = vmax.f32 %v705_v27, 0.0 }
  0xd4   : > { %v844_v58 = vmax.f32 %v755_v55, 0.0  ;;  %v693_v55 = vadd.f32 %v1627_v52, %v1596_v32 }
  0xd6   : > { %912 = vmatpush.xpose.msrb.mxu3 %v844_v58  ;;  %v819_v58 = vmax.f32 %v693_v55, 0.0 }
  0xd8   : > { %v707_v61 = vpop.f32.mrf.mxu2 }
  0xd9   : > { %v1634_v62 = vpop.f32.mrf.mxu3  ;;  %v708_v22 = vadd.f32 %v1627_v52, %v707_v61 }
  0xda   : > { %913 = vmatpush.xpose.msrb.mxu3 %v843_v60  ;;  %v1636_v63 = vpop.f32.mrf.mxu0 }
  0xdb   : > { %v825_v26 = vmax.f32 %v708_v22, 0.0 }
  0xde   : > { %914 = vmatpush.xpose.msrb.mxu3 %v842_v1 }
  0xe0   : > { %v709_v4 = vpop.f32.mrf.mxu2 }
  0xe1   : > { %v1640_v5 = vpop.f32.mrf.mxu3  ;;  %v710_v19 = vadd.f32 %v1627_v52, %v709_v4 }
  0xe2   : > { %915 = vmatpush.xpose.msrb.mxu3 %v841_v3  ;;  %v1642_v6 = vpop.f32.mrf.mxu0 }
  0xe3   : > { %v826_v23 = vmax.f32 %v710_v19, 0.0 }
  0xe6   : > { %916 = vmatpush.xpose.msrb.mxu3 %v840_v8 }
  0xe8   : > { %v712_v10 = vpop.f32.mrf.mxu2 }
  0xe9   : > { %v1645_v11 = vpop.f32.mrf.mxu3  ;;  %v713_v14 = vadd.f32 %v1627_v52, %v712_v10 }
  0xea   : > { %917 = vmatpush.xpose.msrb.mxu3 %v839_v9  ;;  %v1647_v12 = vpop.f32.mrf.mxu0 }
  0xeb   : > { %v827_v20 = vmax.f32 %v713_v14, 0.0  ;;  %v660_v22 = vadd.f32 %v1627_v52, %v1647_v12  ;;  %v653_v12 = vadd.f32 %v1627_v52, %v1630_v56 }
  0xf0   : > { %v714_v13 = vpop.f32.mrf.mxu2 }
  0xf1   : > { %v715_v15 = vadd.f32 %v1627_v52, %v714_v13  ;;  %v1651_v16 = vpop.f32.mrf.mxu3 }
  0xf2   : > { %v1653_v17 = vpop.f32.mrf.mxu0 }
  0xf3   : > { %v828_v18 = vmax.f32 %v715_v15, 0.0 }
  0xf5   : > { %892 = vmatpush.xpose.msrb.mxu2 %v828_v18  ;;  %v663_v18 = vadd.f32 %v1627_v52, %v1653_v17  ;;  %v655_v17 = vadd.f32 %v1627_v52, %v1636_v63 }
  0xf8   : > { %v1656_v21 = vpop.f32.mrf.mxu2 }
  0xf9   : > { %893 = vmatpush.xpose.msrb.mxu2 %v827_v20  ;;  %v1659_v24 = vpop.f32.mrf.mxu3 }
  0xfa   : > { %v664_v25 = vpop.f32.mrf.mxu0 }
  0xfb   : > { %v665_v10 = vadd.f32 %v1627_v52, %v664_v25  ;;  %v658_v25 = vadd.f32 %v1627_v52, %v1642_v6  ;;  %v650_v6 = vadd.f32 %v1627_v52, %v1622_v51  ;;  %v645_v51 = vadd.f32 %v1627_v52, %v1612_v43 }
  0xfd   : > { %894 = vmatpush.xpose.msrb.mxu2 %v826_v23  ;;  %v808_v19 = vmax.f32 %v665_v10, 0.0  ;;  %v807_v23 = vmax.f32 %v663_v18, 0.0  ;;  %v800_v10 = vmax.f32 %v645_v51, 0.0 }
 0x100   : > { %v1662_v28 = vpop.f32.mrf.mxu2 }
 0x101   : > { %895 = vmatpush.xpose.msrb.mxu2 %v825_v26  ;;  %v1664_v29 = vpop.f32.mrf.mxu3 }
 0x102   : > { %v667_v31 = vpop.f32.mrf.mxu0 }
 0x103   : > { %v668_v7 = vadd.f32 %v1627_v52, %v667_v31  ;;  %v806_v31 = vmax.f32 %v660_v22, 0.0 }
 0x105   : > { %896 = vmatpush.xpose.msrb.mxu2 %v824_v36  ;;  %v809_v13 = vmax.f32 %v668_v7, 0.0  ;;  %v805_v36 = vmax.f32 %v658_v25, 0.0 }
 0x108   : > { %v1669_v40 = vpop.f32.mrf.mxu2 }
 0x109   : > { %897 = vmatpush.xpose.msrb.mxu2 %v823_v38  ;;  %v1671_v42 = vpop.f32.mrf.mxu3 }
 0x10a   : > { %v669_v45 = vpop.f32.mrf.mxu0 }
 0x10b   : > { %v670_v2 = vadd.f32 %v1627_v52, %v669_v45  ;;  %v804_v45 = vmax.f32 %v655_v17, 0.0 }
 0x10d   : > { %898 = vmatpush.xpose.msrb.mxu2 %v822_v48  ;;  %v810_v8 = vmax.f32 %v670_v2, 0.0  ;;  %v803_v48 = vmax.f32 %v653_v12, 0.0 }
 0x110   : > { %v1677_v53 = vpop.f32.mrf.mxu2 }
 0x111   : > { %899 = vmatpush.xpose.msrb.mxu2 %v821_v50  ;;  %v1679_v44 = vpop.f32.mrf.mxu3 }
 0x112   : > { %v672_v54 = vpop.f32.mrf.mxu0 }
 0x113   : > { %v673_v61 = vadd.f32 %v1627_v52, %v672_v54 }
 0x115   : > { %900 = vmatpush.xpose.msrb.mxu2 %v820_v57  ;;  %v811_v32 = vmax.f32 %v673_v61, 0.0  ;;  %v648_v57 = vadd.f32 %v1627_v52, %v1617_v47 }
 0x118   : > { %v1683_v59 = vpop.f32.mrf.mxu2 }
 0x119   : > { %901 = vmatpush.xpose.msrb.mxu2 %v819_v58  ;;  %v1685_v41 = vpop.f32.mrf.mxu3  ;;  %v802_v58 = vmax.f32 %v650_v6, 0.0 }
 0x11a   : > { %v674_v60 = vpop.f32.mrf.mxu0 }
 0x11b   : > { %v675_v35 = vadd.f32 %v1627_v52, %v674_v60 }
 0x11d   : > { %v812_v0 = vmax.f32 %v675_v35, 0.0  ;;  %v801_v35 = vmax.f32 %v648_v57, 0.0 }
 0x11f   : > { %872 = vmatpush.xpose.msra.mxu1 %v812_v0 }
 0x120   : > { %v1689_v1 = vpop.f32.mrf.mxu2 }
 0x121   : > { %v1692_v3 = vpop.f32.mrf.mxu3  ;;  %v730_v43 = vadd.f32 %v1627_v52, %v1689_v1 }
 0x122   : > { %v1694_v4 = vpop.f32.mrf.mxu0 }
 0x123   : > { %873 = vmatpush.xpose.msra.mxu1 %v811_v32 }
 0x127   : > { %874 = vmatpush.xpose.msra.mxu1 %v810_v8  ;;  %v643_v8 = vadd.f32 %v1627_v52, %v1604_v39  ;;  %v728_v39 = vadd.f32 %v1627_v52, %v1683_v59 }
 0x128   : > { %v732_v9 = vpop.f32.mrf.mxu2 }
 0x129   : > { %v1698_v14 = vpop.f32.mrf.mxu3  ;;  %v733_v61 = vadd.f32 %v1627_v52, %v732_v9  ;;  %v799_v22 = vmax.f32 %v643_v8, 0.0 }
 0x12a   : > { %v1700_v15 = vpop.f32.mrf.mxu0 }
 0x12b   : > { %875 = vmatpush.xpose.msra.mxu1 %v809_v13  ;;  %v835_v13 = vmax.f32 %v733_v61, 0.0 }
 0x12f   : > { %876 = vmatpush.xpose.msra.mxu1 %v808_v19 }
 0x130   : > { %v734_v20 = vpop.f32.mrf.mxu2 }
 0x131   : > { %v1706_v26 = vpop.f32.mrf.mxu3  ;;  %v735_v56 = vadd.f32 %v1627_v52, %v734_v20  ;;  %v640_v20 = vadd.f32 %v1627_v52, %v1598_v34  ;;  %v725_v34 = vadd.f32 %v1627_v52, %v1677_v53  ;;  %v678_v53 = vadd.f32 %v1627_v52, %v1694_v4 }
 0x132   : > { %v682_v27 = vpop.f32.mrf.mxu0  ;;  %v718_v4 = vadd.f32 %v1627_v52, %v1656_v21  ;;  %v780_v21 = vadd.f32 %v1627_v52, %v1692_v3  ;;  %v770_v3 = vadd.f32 %v1627_v52, %v1664_v29  ;;  %v760_v29 = vadd.f32 %v1627_v52, %v1640_v5 }
 0x133   : > { %877 = vmatpush.xpose.msra.mxu1 %v807_v23  ;;  %v836_v0 = vmax.f32 %v735_v56, 0.0  ;;  %v834_v23 = vmax.f32 %v730_v43, 0.0  ;;  %v683_v25 = vadd.f32 %v1627_v52, %v682_v27  ;;  %v798_v17 = vmax.f32 %v640_v20, 0.0 }
 0x134   : > { %v680_v27 = vadd.f32 %v1627_v52, %v1700_v15  ;;  %v832_v6 = vmax.f32 %v725_v34, 0.0  ;;  %v720_v15 = vadd.f32 %v1627_v52, %v1662_v28  ;;  %v829_v56 = vmax.f32 %v718_v4, 0.0 }
 0x135   : > { %v815_v12 = vmax.f32 %v683_v25, 0.0  ;;  %v854_v61 = vmax.f32 %v780_v21, 0.0 }
 0x137   : > { %878 = vmatpush.xpose.msra.mxu1 %v806_v31 }
 0x138   : > { %v737_v33 = vpop.f32.mrf.mxu2 }
 0x139   : > { %v1712_v37 = vpop.f32.mrf.mxu3  ;;  %v738_v49 = vadd.f32 %v1627_v52, %v737_v33  ;;  %v638_v33 = vadd.f32 %v1627_v52, %v1590_v30  ;;  %v723_v30 = vadd.f32 %v1627_v52, %v1669_v40 }
 0x13a   : > { %v684_v38 = vpop.f32.mrf.mxu0  ;;  %v788_v40 = vadd.f32 %v1627_v52, %v1712_v37  ;;  %v861_v37 = vld [vmem:[%s1825_s4] sm:$0x1] }
 0x13b   : > { %879 = vmatpush.xpose.msra.mxu1 %v805_v36  ;;  %v837_v60 = vmax.f32 %v738_v49, 0.0  ;;  %v685_v9 = vadd.f32 %v1627_v52, %v684_v38  ;;  %v833_v38 = vmax.f32 %v728_v39, 0.0  ;;  %v797_v59 = vmax.f32 %v638_v33, 0.0 }
 0x13c   : > { %v857_v28 = vmax.f32 %v788_v40, 0.0 }
 0x13d   : > { %v816_v31 = vmax.f32 %v685_v9, 0.0 }
 0x13f   : > { %880 = vmatpush.xpose.msra.mxu1 %v804_v45 }
 0x140   : > { %v739_v46 = vpop.f32.mrf.mxu2 }
 0x141   : > { %v740_v50 = vadd.f32 %v1627_v52, %v739_v46  ;;  %v789_v63 = vpop.f32.mrf.mxu3 }
 0x142   : > { %v687_v54 = vpop.f32.mrf.mxu0  ;;  %v790_v49 = vadd.f32 %v1627_v52, %v789_v63  ;;  %v785_v63 = vadd.f32 %v1627_v52, %v1706_v26 }
 0x143   : > { %v838_v55 = vmax.f32 %v740_v50, 0.0  ;;  %881 = vmatpush.xpose.msra.mxu1 %v803_v48  ;;  %v688_v7 = vadd.f32 %v1627_v52, %v687_v54  ;;  %v814_v48 = vmax.f32 %v680_v27, 0.0  ;;  %v831_v54 = vmax.f32 %v723_v30, 0.0 }
 0x144   : > { %v858_v57 = vmax.f32 %v790_v49, 0.0  ;;  %v856_v51 = vmax.f32 %v785_v63, 0.0 }
 0x145   : > { %918 = vmatpush.xpose.msrb.mxu3 %v838_v55  ;;  %v817_v19 = vmax.f32 %v688_v7, 0.0  ;;  %v813_v55 = vmax.f32 %v678_v53, 0.0 }
 0x147   : > { %882 = vmatpush.xpose.msra.mxu1 %v802_v58  ;;  %v830_v58 = vmax.f32 %v720_v15, 0.0 }
 0x149   : > { %919 = vmatpush.xpose.msrb.mxu3 %v837_v60  ;;  %v792_v2 = vpop.f32.mrf.mxu3  ;;  %v783_v60 = vadd.f32 %v1627_v52, %v1698_v14  ;;  %v775_v14 = vadd.f32 %v1627_v52, %v1679_v44  ;;  %v765_v44 = vadd.f32 %v1627_v52, %v1651_v16 }
 0x14a   : > { %v689_v32 = vpop.f32.mrf.mxu0  ;;  %v793_v45 = vadd.f32 %v1627_v52, %v792_v2  ;;  %v773_v2 = vadd.f32 %v1627_v52, %v1671_v42  ;;  %v763_v42 = vadd.f32 %v1627_v52, %v1645_v11  ;;  %v862_v11 = vld [vmem:[%s269_s15] sm:$0xf] }
 0x14b   : > { %v690_v47 = vadd.f32 %v1627_v52, %v689_v32  ;;  %883 = vmatpush.xpose.msra.mxu1 %v801_v35  ;;  %v855_v26 = vmax.f32 %v783_v60, 0.0  ;;  %v778_v35 = vadd.f32 %v1627_v52, %v1685_v41  ;;  %v852_v32 = vmax.f32 %v775_v14, 0.0 }
 0x14c   : > { %v859_v50 = vmax.f32 %v793_v45, 0.0  ;;  %v851_v7 = vmax.f32 %v773_v2, 0.0  ;;  %v768_v41 = vadd.f32 %v1627_v52, %v1659_v24  ;;  %v758_v24 = vadd.f32 %v1627_v52, %v1634_v62 }
 0x14d   : > { %v818_v18 = vmax.f32 %v690_v47, 0.0  ;;  %920 = vmatpush.xpose.msrb.mxu3 %v836_v0  ;;  %v853_v0 = vmax.f32 %v778_v35, 0.0  ;;  %v850_v47 = vmax.f32 %v770_v3, 0.0  ;;  %v865_v5 = vperm.slane %v862_v11, 1 }
 0x14e   : > { %v849_v8 = vmax.f32 %v768_v41, 0.0  ;;  %v845_v43 = vmax.f32 %v758_v24, 0.0  ;;  %v866_v9 = vperm.slane %v862_v11, 2  ;;  %v864_v20 = vperm.slane %v862_v11, 0 }
 0x14f   : > { %884 = vmatpush.xpose.msra.mxu1 %v800_v10  ;;  %902 = vmatpush.xpose.msrb.mxu2 %v818_v18  ;;  %v848_v10 = vmax.f32 %v765_v44, 0.0  ;;  %v846_v18 = vmax.f32 %v760_v29, 0.0 }
 0x151   : > { %921 = vmatpush.xpose.msrb.mxu3 %v835_v13  ;;  %v794_v1 = vpop.f32.mrf.mxu3  ;;  %v847_v13 = vmax.f32 %v763_v42, 0.0 }
 0x152   : > { %v795_v36 = vadd.f32 %v1627_v52, %v794_v1 }
 0x153   : > { %885 = vmatpush.xpose.msra.mxu1 %v799_v22  ;;  %903 = vmatpush.xpose.msrb.mxu2 %v817_v19  ;;  %v953_v22 = vstv %s952_s16 }
 0x154   : > { %v860_v46 = vmax.f32 %v795_v36, 0.0 }
 0x155   : > { %922 = vmatpush.xpose.msrb.mxu3 %v834_v23 }
 0x157   : > { %886 = vmatpush.xpose.msra.mxu1 %v798_v17  ;;  %904 = vmatpush.xpose.msrb.mxu2 %v816_v31 }
 0x159   : > { %923 = vmatpush.xpose.msrb.mxu3 %v833_v38 }
 0x15b   : > { %887 = vmatpush.xpose.msra.mxu1 %v797_v59  ;;  %905 = vmatpush.xpose.msrb.mxu2 %v815_v12  ;;  %v867_v12 = vperm.slane %v862_v11, 3 }
 0x15d   : > { %924 = vmatpush.xpose.msrb.mxu3 %v832_v6 }
 0x15e   : > { %888 = vmatmul.f32.vlgmr.msra.gmra.mxu1 %v861_v37 }
 0x15f   : > { %932 = vmatpush.xpose.msrb.mxu1 %v860_v46  ;;  %906 = vmatpush.xpose.msrb.mxu2 %v814_v48 }
 0x161   : > { %925 = vmatpush.xpose.msrb.mxu3 %v831_v54 }
 0x163   : > { %933 = vmatpush.xpose.msrb.mxu1 %v859_v50  ;;  %907 = vmatpush.xpose.msrb.mxu2 %v813_v55 }
 0x165   : > { %926 = vmatpush.xpose.msrb.mxu3 %v830_v58  ;;  %v992_v58 = vlaneseq }
 0x166   : > { %908 = vmatmul.f32.vlgmr.msrb.gmra.mxu2 %v861_v37 }
 0x167   : > { %934 = vmatpush.xpose.msrb.mxu1 %v858_v57  ;;  %vm994_vm4 = vcmp.lt.s32.totalorder %v992_v58, 512 }
 0x169   : > { %927 = vmatpush.xpose.msrb.mxu3 %v829_v56 }
 0x16b   : > { %935 = vmatpush.xpose.msrb.mxu1 %v857_v28 }
 0x16c   : > { %928 = vmatmul.f32.vlgmr.msrb.gmra.mxu3 %v861_v37 }
 0x16f   : > { %936 = vmatpush.xpose.msrb.mxu1 %v856_v51 }
 0x173   : > { %937 = vmatpush.xpose.msrb.mxu1 %v855_v26 }
 0x177   : > { %938 = vmatpush.xpose.msrb.mxu1 %v854_v61 }
 0x17b   : > { %939 = vmatpush.xpose.msrb.mxu1 %v853_v0 }
 0x17f   : > { %940 = vmatpush.xpose.msrb.mxu1 %v852_v32 }
 0x183   : > { %941 = vmatpush.xpose.msrb.mxu1 %v851_v7 }
 0x187   : > { %942 = vmatpush.xpose.msrb.mxu1 %v850_v47 }
 0x18b   : > { %943 = vmatpush.xpose.msrb.mxu1 %v849_v8 }
 0x18f   : > { %944 = vmatpush.xpose.msrb.mxu1 %v848_v10 }
 0x193   : > { %945 = vmatpush.xpose.msrb.mxu1 %v847_v13 }
 0x197   : > { %946 = vmatpush.xpose.msrb.mxu1 %v846_v18 }
 0x19b   : > { %947 = vmatpush.xpose.msrb.mxu1 %v845_v43 }
 0x19e   : > { %948 = vmatmul.f32.vlgmr.msrb.gmra.mxu1 %v861_v37 }
 0x1db   : > { %v889_v62 = vpop.f32.mrf.mxu1 }
 0x1dc   : > { %v890_v23 = vadd.f32 %v889_v62, %v864_v20 }
 0x1de   : > { %v954_v1 = vadd.f32 %v953_v22, %v890_v23 }
 0x1e0   : > { %v958_v36 = vsub.f32 0.0, %v954_v1 }
 0x1e2   : > { %v962_v59 = vmul.f32 1.442695, %v958_v36 }
 0x1e9   : > { %v909_v16 = vpop.f32.mrf.mxu2 }
 0x1ea   : > { %v910_v52 = vadd.f32 %v909_v16, %v865_v5 }
 0x1ec   : > { %v955_v25 = vadd.f32 %v953_v22, %v910_v52 }
 0x1ee   : > { %v959_v33 = vsub.f32 0.0, %v955_v25 }
 0x1ef   : > { %v929_v19 = vpop.f32.mrf.mxu3 }
 0x1f0   : > { %v930_v39 = vadd.f32 %v929_v19, %v866_v9  ;;  %v964_v34 = vmul.f32 1.442695, %v959_v33 }
 0x1f2   : > { %v956_v31 = vadd.f32 %v953_v22, %v930_v39  ;;  %1356 = vpow2.f32 %v964_v34 }
 0x1f4   : > { %v960_v17 = vsub.f32 0.0, %v956_v31 }
 0x1f6   : > { %v966_v38 = vmul.f32 1.442695, %v960_v17 }
 0x1f8   : > { %1358 = vpow2.f32 %v966_v38  ;;  %v1357_v6 = vpop.eup %1356 }
 0x1f9   : > { %1360 = vpow2.f32 %v962_v59  ;;  %v971_v49 = vadd.f32 1.0, %v1357_v6 }
 0x1fe   : > { %v1359_v53 = vpop.eup %1358 }
 0x1ff   : > { %v1361_v50 = vpop.eup %1360  ;;  %v972_v15 = vadd.f32 1.0, %v1359_v53 }
 0x200   : > { %v970_v54 = vadd.f32 1.0, %v1361_v50 }
 0x21b   : > { %v949_v27 = vpop.f32.mrf.mxu1 }
 0x21c   : > { %v950_v45 = vadd.f32 %v949_v27, %v867_v12 }
 0x21e   : > { %v957_v46 = vadd.f32 %v953_v22, %v950_v45 }
 0x220   : > { %v961_v30 = vsub.f32 0.0, %v957_v46 }
 0x222   : > { %v968_v48 = vmul.f32 1.442695, %v961_v30 }
 0x224   : > { %1362 = vpow2.f32 %v968_v48 }
 0x225   : > { %1364 = vrcp.f32 %v971_v49 }
 0x226   : > { %1366 = vrcp.f32 %v972_v15 }
 0x227   : > { %1368 = vrcp.f32 %v970_v54 }
 0x22a   : > { %v1363_v55 = vpop.eup %1362 }
 0x22b   : > { %v973_v40 = vadd.f32 1.0, %v1363_v55  ;;  %v1365_v57 = vpop.eup %1364 }
 0x22c   : > { %v1367_v4 = vpop.eup %1366  ;;  %v982_v28 = vrot.slane %v1365_v57, 7 }
 0x22d   : > { %1370 = vrcp.f32 %v973_v40  ;;  %v1369_v63 = vpop.eup %1368  ;;  %v983_v56 = vrot.slane %v1367_v4, 6 }
 0x22e   : > { %v986_v37 = vsel %vm985_vm1, %v1369_v63, %v982_v28 }
 0x233   : > { %v1371_v60 = vpop.eup %1370 }
 0x234   : > { %v984_v51 = vrot.slane %v1371_v60, 5 }
 0x236   : > { %v988_v21 = vsel %vm987_vm2, %v983_v56, %v984_v51 }
 0x237   : > { %v990_v26 = vsel %vm989_vm3, %v986_v37, %v988_v21 }
 0x238   : > { %996 = vst.msk [vmem:[%s259_s27] sm:$0xf] %vm994_vm4, %v990_v26 }
 0x239   : > { %1399 = shalt.err (!%p1396_p4)
}
 0x23a   : > { %1316 = dma.vmem_to_hbm [thread:$0]  (%p1512_p5), %s1011_s29, 64, %s1013_s30, %s998_s5  }
 0x23b PF: > { %p1322_p7 = scmp.ge.s32.totalorder %s1434_s26, 2  ;;  %s1024_s17 = sand.u32 1, %s1422_s23  }
 0x23c   : > { %s1025_s18 = scalar_lea.sflag [#allocation4], %s1024_s17 }
 0x23d   : > { %p1319_p8 = pnand %p1322_p7, %p1516_p6 }
 0x23f   : > { %p1320_p9 = pneg %p1319_p8 }
 0x241   : > { %1417 = dma.done.wait (%p1320_p9), %s1025_s18, 64  }
 0x242   : > { %1419 = vsyncadd (%p1320_p9), %s1025_s18, 4294967232  ;;  %p17_p10 = scmp.ge.s32.totalorder %s1499_s28, 4   ;;  %s1830_s23 = smov %s1426_s24 }
 0x243   : > { %s1831_s24 = smov %s1430_s25  ;;  %s1832_s25 = smov %s1510_s7 }
 0x244   : > { %s1833_s26 = smov %s1499_s28  ;;  %19 = sbr.rel (!%p17_p10) target bundleno = 5 (0x5), region = 82 }
 0x249   :  { %1031 = vsyncpa [#allocation4], 1 }
 0x24a   :  { %1033 = vsyncpa [#allocation4 + $0x1], 1 }

</bundles_post_ra>
